<compile_context>
chip_gen: v5e
topology: v5e:2x2
jax: 0.10.0
libtpu: 0.0.40
codegen_flags: <defaults>
</compile_context>

<pallas_src>
import functools

import jax
import jax.numpy as jnp
from jax import lax
from jax.experimental import pallas as pl
from jax.experimental.pallas import tpu as pltpu


def _sigmoid(z):
    # torch.nn.Sigmoid semantics.  exp() runs on the EUP; the divide is kept
    # exact (pl.reciprocal(approx=True) would be cheaper but its ~2^-12
    # relative error is tight against the 1e-4 check below).
    return 1.0 / (1.0 + jnp.exp(-z))


def _cbam_kernel(x_ref, w1_ref, b1_ref, w2_ref, b2_ref, wm_ref, bc_ref, o_ref,
                 *, width):
    """One grid step processes a (Bb, C, HW) block of images.

    x_ref : (Bb, C, HW) input block (compute is f32)
    w1_ref: (Cr, C)  b1_ref: (Cr, 1)   spectrally-normalized fc1 (1x1 conv)
    w2_ref: (C, Cr)  b2_ref: (C, 1)    spectrally-normalized fc2 (1x1 conv)
    wm_ref: (18, HW) weight-folded SAME-padding masks of the 3x3 spatial conv
                     (row ci*9 + kh*3 + kw == wc[ci,kh,kw] * valid(kh,kw,:))
    bc_ref: (1,) SMEM scalar -- spatial conv bias
    o_ref : (Bb, C, HW) output block
    """
    bb, _, hw = x_ref.shape

    # Hoisted, loop-invariant loads / broadcasts (not rebuilt per image).
    w1 = w1_ref[...]
    b1 = b1_ref[...]
    w2 = w2_ref[...]
    b2 = b2_ref[...]
    wm = wm_ref[...]
    acc0 = jnp.zeros((1, hw), jnp.float32) + bc_ref[0]

    def per_image(b):
        xb = x_ref[b].astype(jnp.float32)                      # (C, HW)

        # ---------------- channel attention ----------------
        # Both pooled branches fused into one (C, 2) right-hand side.
        avg_c = jnp.mean(xb, axis=1, keepdims=True)            # (C, 1)
        max_c = jnp.max(xb, axis=1, keepdims=True)             # (C, 1)
        pooled = jnp.concatenate([avg_c, max_c], axis=1)       # (C, 2)
        h = jnp.maximum(
            jnp.dot(w1, pooled, preferred_element_type=jnp.float32) + b1, 0.0)
        z = jnp.dot(w2, h, preferred_element_type=jnp.float32) + b2   # (C, 2)
        ch_att = _sigmoid(z[:, 0:1] + z[:, 1:2])               # (C, 1)
        x1 = xb * ch_att                                       # (C, HW)

        # ---------------- spatial attention ----------------
        avg_s = jnp.mean(x1, axis=0, keepdims=True)            # (1, HW)
        max_s = jnp.max(x1, axis=0, keepdims=True)             # (1, HW)
        maps = jnp.concatenate([avg_s, max_s], axis=0)         # (2, HW)

        # 3x3 same-padded conv over the 2-channel (avg, max) map, done in the
        # flattened layout: each tap is a static lane roll (XLU slot) of `maps`
        # times a weight-folded zero-padding mask (VPU) -- no MXU, no reshape.
        acc = acc0
        for kh in range(3):
            for kw in range(3):
                shift = (-((kh - 1) * width + (kw - 1))) % hw
                tap = kh * 3 + kw
                r = maps if shift == 0 else pltpu.roll(maps, shift=shift, axis=1)
                acc = acc + r[0:1] * wm[tap:tap + 1] + r[1:2] * wm[9 + tap:10 + tap]

        sp_att = _sigmoid(acc)                                 # (1, HW)
        o_ref[b] = (x1 * sp_att).astype(o_ref.dtype)

    if bb == 1:
        per_image(0)
    else:
        def body(b, carry):
            per_image(b)
            return carry
        lax.fori_loop(0, bb, body, 0)


# --------------------------- wrapper / pallas_call ---------------------------

def _fold_conv_weight_masks(wc, H, W):
    """wc: (2, 3, 3) spectrally-normalized spatial conv weight (O=1 squeezed).
    Returns (18, H*W) f32: row ci*9+kh*3+kw = wc[ci,kh,kw] * SAME-padding mask."""
    HW = H * W
    p = jnp.arange(HW, dtype=jnp.int32)
    row = p // W
    col = p % W
    rows = []
    for ci in range(2):
        for kh in range(3):
            for kw in range(3):
                dh, dw = kh - 1, kw - 1
                valid = ((row + dh >= 0) & (row + dh < H) &
                         (col + dw >= 0) & (col + dw < W)).astype(jnp.float32)
                rows.append(wc[ci, kh, kw] * valid)
    return jnp.stack(rows, axis=0)


def _pick_block_batch(B, slab_bytes, max_block_bytes=1 << 20):
    """Largest divisor of B whose block fits ~1 MiB, preferring >= 2 grid steps
    (v7x has 2 TensorCores; keep both busy).  No effect on v5e/v6e (1 TC)."""
    bb = max(1, min(B, max_block_bytes // max(slab_bytes, 1)))
    while B % bb:
        bb -= 1
    while bb > 1 and (B // bb) < 2:
        bb -= 1
        while B % bb:
            bb -= 1
    return bb


def cbam_attention(x, w1, b1, w2, b2, wc, bc, *, block_batch=None):
    """CBAM forward.  x: (B, C, H, W) (f32 or bf16).
    w1:(Cr,C) b1:(Cr,1) w2:(C,Cr) b2:(C,1) wc:(2,3,3) bc:(1,)."""
    B, C, H, W = x.shape
    HW = H * W
    Cr = w1.shape[0]

    xf = x.reshape(B, C, HW)                      # lane-dense minor dimension
    wm = _fold_conv_weight_masks(wc, H, W)        # (18, HW)

    slab_bytes = C * HW * x.dtype.itemsize
    bb = block_batch if block_batch is not None else _pick_block_batch(B, slab_bytes)
    assert B % bb == 0, "block_batch must divide the batch size"
    block_bytes = bb * slab_bytes
    # double-buffered in + out blocks + params, with headroom; safe on all gens.
    vmem_limit = int(min(32 << 20, max(16 << 20, 4 * block_bytes + (4 << 20))))

    out = pl.pallas_call(
        functools.partial(_cbam_kernel, width=W),
        out_shape=jax.ShapeDtypeStruct((B, C, HW), x.dtype),
        grid=(B // bb,),
        in_specs=[
            pl.BlockSpec((bb, C, HW), lambda g: (g, 0, 0)),
            pl.BlockSpec((Cr, C), lambda g: (0, 0)),
            pl.BlockSpec((Cr, 1), lambda g: (0, 0)),
            pl.BlockSpec((C, Cr), lambda g: (0, 0)),
            pl.BlockSpec((C, 1), lambda g: (0, 0)),
            pl.BlockSpec((2 * 9, HW), lambda g: (0, 0)),
            pl.BlockSpec(memory_space=pltpu.MemorySpace.SMEM),
        ],
        out_specs=pl.BlockSpec((bb, C, HW), lambda g: (g, 0, 0)),
        compiler_params=pltpu.CompilerParams(
            dimension_semantics=("parallel",),
            vmem_limit_bytes=vmem_limit),
    )(xf, w1, b1, w2, b2, wm, bc)
    return out.reshape(B, C, H, W)


# --------------------- parameter prep (plain JAX glue) ---------------------

def spectral_normalize(weight, u, eps=1e-12):
    # SN.W_() with num_svs=1, num_itrs=1: one power-iteration step, W / sv0.
    w_mat = weight.reshape(weight.shape[0], -1)              # (out, K)
    v = u @ w_mat                                            # (1, K)
    v = v / jnp.maximum(jnp.linalg.norm(v), eps)
    u_new = v @ w_mat.T                                      # (1, out)
    u_new = u_new / jnp.maximum(jnp.linalg.norm(u_new), eps)
    sv = jnp.squeeze((v @ w_mat.T) @ u_new.T)                # scalar
    return weight / sv


def init_params(key, channels, reduction=8, attention_kernel_size=3):
    Cr = channels // reduction
    ks = attention_kernel_size
    k = jax.random.split(key, 9)
    return {
        "fc1_w": 0.1 * jax.random.normal(k[0], (Cr, channels, 1, 1), jnp.float32),
        "fc1_b": 0.1 * jax.random.normal(k[1], (Cr,), jnp.float32),
        "fc1_u": jax.random.normal(k[2], (1, Cr), jnp.float32),
        "fc2_w": 0.1 * jax.random.normal(k[3], (channels, Cr, 1, 1), jnp.float32),
        "fc2_b": 0.1 * jax.random.normal(k[4], (channels,), jnp.float32),
        "fc2_u": jax.random.normal(k[5], (1, channels), jnp.float32),
        "conv_w": 0.1 * jax.random.normal(k[6], (1, 2, ks, ks), jnp.float32),
        "conv_b": 0.1 * jax.random.normal(k[7], (1,), jnp.float32),
        "conv_u": jax.random.normal(k[8], (1, 1), jnp.float32),
    }


def effective_params(p):
    w1 = spectral_normalize(p["fc1_w"], p["fc1_u"])          # (Cr, C, 1, 1)
    w2 = spectral_normalize(p["fc2_w"], p["fc2_u"])          # (C, Cr, 1, 1)
    wc = spectral_normalize(p["conv_w"], p["conv_u"])        # (1, 2, 3, 3)
    return (
        w1.reshape(w1.shape[0], w1.shape[1]),
        p["fc1_b"].reshape(-1, 1),
        w2.reshape(w2.shape[0], w2.shape[1]),
        p["fc2_b"].reshape(-1, 1),
        wc.reshape(2, 3, 3),
        p["conv_b"],
    )


# --------------------- pure-JAX reference (for checking) ---------------------

def cbam_reference(x, w1, b1, w2, b2, wc, bc):
    avg = jnp.mean(x, axis=(2, 3), keepdims=True)
    mx = jnp.max(x, axis=(2, 3), keepdims=True)

    def fc(v, w, b):
        return jnp.einsum("oc,bcij->boij", w, v) + b.reshape(1, -1, 1, 1)

    a = jax.nn.relu(fc(avg, w1, b1))
    m = jax.nn.relu(fc(mx, w1, b1))
    ch = _sigmoid(fc(a, w2, b2) + fc(m, w2, b2))
    x1 = x * ch
    cat = jnp.concatenate(
        [jnp.mean(x1, axis=1, keepdims=True), jnp.max(x1, axis=1, keepdims=True)],
        axis=1)
    sp = lax.conv_general_dilated(
        cat, wc.reshape(1, 2, 3, 3), window_strides=(1, 1), padding="SAME",
        dimension_numbers=("NCHW", "OIHW", "NCHW"))
    sp = _sigmoid(sp + bc.reshape(1, 1, 1, 1))
    return x1 * sp


if __name__ == "__main__":
    channels, reduction = 16, 8
    B, H, W = 2, 16, 16

    key = jax.random.PRNGKey(0)
    kx, kp = jax.random.split(key)
    x = jax.random.normal(kx, (B, channels, H, W), jnp.float32)
    params = init_params(kp, channels, reduction)
    w1, b1, w2, b2, wc, bc = effective_params(params)

    out = cbam_attention(x, w1, b1, w2, b2, wc, bc)
    out = jax.block_until_ready(out)

    ref = cbam_reference(x, w1, b1, w2, b2, wc, bc)
    assert out.shape == x.shape
    err = float(jnp.max(jnp.abs(out - ref)))
    assert jnp.allclose(out, ref, atol=1e-4, rtol=1e-4), f"max abs err {err}"

    print("KERNEL_OK")
</pallas_src>

<mosaic_0001>
module attributes {stable_mosaic.version = 11 : i64} {
  func.func @_cbam_kernel(%arg0: i32, %arg1: memref<1x16x256xf32, #tpu.memory_space<vmem>>, %arg2: memref<2x16xf32, #tpu.memory_space<vmem>>, %arg3: memref<2x1xf32, #tpu.memory_space<vmem>>, %arg4: memref<16x2xf32, #tpu.memory_space<vmem>>, %arg5: memref<16x1xf32, #tpu.memory_space<vmem>>, %arg6: memref<18x256xf32, #tpu.memory_space<vmem>>, %arg7: memref<1xf32, #tpu.memory_space<smem>>, %arg8: memref<1x16x256xf32, #tpu.memory_space<vmem>>) attributes {dimension_semantics = [#tpu.dimension_semantics<parallel>], iteration_bounds = array<i64: 2>, scalar_prefetch = 0 : i64, scratch_operands = 0 : i64, tpu.core_type = #tpu.core_type<tc>, window_params = [{transform_indices = @transform_0, window_bounds = array<i64: 1, 16, 256>}, {pipeline_mode = #tpu.pipeline_mode<synchronous>, transform_indices = @transform_1, window_bounds = array<i64: 2, 16>}, {pipeline_mode = #tpu.pipeline_mode<synchronous>, transform_indices = @transform_2, window_bounds = array<i64: 2, 1>}, {pipeline_mode = #tpu.pipeline_mode<synchronous>, transform_indices = @transform_3, window_bounds = array<i64: 16, 2>}, {pipeline_mode = #tpu.pipeline_mode<synchronous>, transform_indices = @transform_4, window_bounds = array<i64: 16, 1>}, {pipeline_mode = #tpu.pipeline_mode<synchronous>, transform_indices = @transform_5, window_bounds = array<i64: 18, 256>}, {transform_indices = @transform_6, window_bounds = array<i64: 1>}, {transform_indices = @transform_7, window_bounds = array<i64: 1, 16, 256>}]} {
    %c0 = arith.constant 0 : index
    %c0_0 = arith.constant 0 : index
    %0 = vector.load %arg2[%c0, %c0_0] : memref<2x16xf32, #tpu.memory_space<vmem>>, vector<2x16xf32>
    %c0_1 = arith.constant 0 : index
    %c0_2 = arith.constant 0 : index
    %1 = vector.load %arg3[%c0_1, %c0_2] : memref<2x1xf32, #tpu.memory_space<vmem>>, vector<2x1xf32>
    %c0_3 = arith.constant 0 : index
    %c0_4 = arith.constant 0 : index
    %2 = vector.load %arg4[%c0_3, %c0_4] : memref<16x2xf32, #tpu.memory_space<vmem>>, vector<16x2xf32>
    %c0_5 = arith.constant 0 : index
    %c0_6 = arith.constant 0 : index
    %3 = vector.load %arg5[%c0_5, %c0_6] : memref<16x1xf32, #tpu.memory_space<vmem>>, vector<16x1xf32>
    %c0_7 = arith.constant 0 : index
    %c0_8 = arith.constant 0 : index
    %4 = vector.load %arg6[%c0_7, %c0_8] : memref<18x256xf32, #tpu.memory_space<vmem>>, vector<18x256xf32>
    %cst = arith.constant 0.000000e+00 : f32
    %5 = vector.broadcast %cst : f32 to vector<1x256xf32>
    %c0_9 = arith.constant 0 : index
    %6 = memref.load %arg7[%c0_9] : memref<1xf32, #tpu.memory_space<smem>>
    %7 = vector.broadcast %6 : f32 to vector<1x256xf32>
    %8 = arith.addf %5, %7 : vector<1x256xf32>
    %c0_10 = arith.constant 0 : index
    %c0_11 = arith.constant 0 : index
    %c0_12 = arith.constant 0 : index
    %9 = vector.load %arg1[%c0_10, %c0_11, %c0_12] : memref<1x16x256xf32, #tpu.memory_space<vmem>>, vector<1x16x256xf32>
    %10 = vector.shape_cast %9 : vector<1x16x256xf32> to vector<16x256xf32>
    %cst_13 = arith.constant dense<0.000000e+00> : vector<16xf32>
    %11 = vector.multi_reduction <add>, %10, %cst_13 [1] : vector<16x256xf32> to vector<16xf32>
    %12 = vector.shape_cast %11 : vector<16xf32> to vector<16x1xf32>
    %cst_14 = arith.constant 2.560000e+02 : f32
    %13 = vector.broadcast %cst_14 : f32 to vector<16x1xf32>
    %14 = arith.divf %12, %13 : vector<16x1xf32>
    %cst_15 = arith.constant dense<0xFF800000> : vector<16xf32>
    %15 = vector.multi_reduction <maximumf>, %10, %cst_15 [1] : vector<16x256xf32> to vector<16xf32>
    %16 = vector.shape_cast %15 : vector<16xf32> to vector<16x1xf32>
    %17 = tpu.concatenate %14, %16 in 1 : vector<16x1xf32>, vector<16x1xf32> -> vector<16x2xf32>
    %cst_16 = arith.constant dense<0.000000e+00> : vector<2x2xf32>
    %18 = tpu.matmul %0, %17, %cst_16 {dimension_numbers = #tpu.dot_dimension_numbers<[1], [0], [0], [1], [0, 0, 1, 1], [], []>} : vector<2x16xf32>, vector<16x2xf32>, vector<2x2xf32> -> vector<2x2xf32>
    %19 = vector.broadcast %1 : vector<2x1xf32> to vector<2x2xf32>
    %20 = arith.addf %18, %19 : vector<2x2xf32>
    %cst_17 = arith.constant 0.000000e+00 : f32
    %21 = vector.broadcast %cst_17 : f32 to vector<2x2xf32>
    %22 = arith.maximumf %20, %21 : vector<2x2xf32>
    %cst_18 = arith.constant dense<0.000000e+00> : vector<16x2xf32>
    %23 = tpu.matmul %2, %22, %cst_18 {dimension_numbers = #tpu.dot_dimension_numbers<[1], [0], [0], [1], [0, 0, 1, 1], [], []>} : vector<16x2xf32>, vector<2x2xf32>, vector<16x2xf32> -> vector<16x2xf32>
    %24 = vector.broadcast %3 : vector<16x1xf32> to vector<16x2xf32>
    %25 = arith.addf %23, %24 : vector<16x2xf32>
    %26 = vector.extract_strided_slice %25 {offsets = [0, 0], sizes = [16, 1], strides = [1, 1]} : vector<16x2xf32> to vector<16x1xf32>
    %27 = vector.extract_strided_slice %25 {offsets = [0, 1], sizes = [16, 1], strides = [1, 1]} : vector<16x2xf32> to vector<16x1xf32>
    %28 = arith.addf %26, %27 : vector<16x1xf32>
    %cst_19 = arith.constant 0.000000e+00 : f32
    %29 = vector.broadcast %cst_19 : f32 to vector<16x1xf32>
    %30 = arith.subf %29, %28 : vector<16x1xf32>
    %31 = math.exp %30 : vector<16x1xf32>
    %cst_20 = arith.constant 1.000000e+00 : f32
    %32 = vector.broadcast %cst_20 : f32 to vector<16x1xf32>
    %33 = arith.addf %32, %31 : vector<16x1xf32>
    %cst_21 = arith.constant 1.000000e+00 : f32
    %34 = vector.broadcast %cst_21 : f32 to vector<16x1xf32>
    %35 = arith.divf %34, %33 : vector<16x1xf32>
    %36 = vector.broadcast %35 : vector<16x1xf32> to vector<16x256xf32>
    %37 = arith.mulf %10, %36 : vector<16x256xf32>
    %cst_22 = arith.constant dense<0.000000e+00> : vector<256xf32>
    %38 = vector.multi_reduction <add>, %37, %cst_22 [0] : vector<16x256xf32> to vector<256xf32>
    %39 = vector.shape_cast %38 : vector<256xf32> to vector<1x256xf32>
    %cst_23 = arith.constant 1.600000e+01 : f32
    %40 = vector.broadcast %cst_23 : f32 to vector<1x256xf32>
    %41 = arith.divf %39, %40 : vector<1x256xf32>
    %cst_24 = arith.constant dense<0xFF800000> : vector<256xf32>
    %42 = vector.multi_reduction <maximumf>, %37, %cst_24 [0] : vector<16x256xf32> to vector<256xf32>
    %43 = vector.shape_cast %42 : vector<256xf32> to vector<1x256xf32>
    %44 = tpu.concatenate %41, %43 in 0 : vector<1x256xf32>, vector<1x256xf32> -> vector<2x256xf32>
    %c17_i32 = arith.constant 17 : i32
    %45 = tpu.dynamic_rotate %44 by %c17_i32 dim 1 : vector<2x256xf32>, i32 -> vector<2x256xf32>
    %46 = vector.extract_strided_slice %45 {offsets = [0, 0], sizes = [1, 256], strides = [1, 1]} : vector<2x256xf32> to vector<1x256xf32>
    %47 = vector.extract_strided_slice %4 {offsets = [0, 0], sizes = [1, 256], strides = [1, 1]} : vector<18x256xf32> to vector<1x256xf32>
    %48 = arith.mulf %46, %47 : vector<1x256xf32>
    %49 = arith.addf %8, %48 : vector<1x256xf32>
    %50 = vector.extract_strided_slice %45 {offsets = [1, 0], sizes = [1, 256], strides = [1, 1]} : vector<2x256xf32> to vector<1x256xf32>
    %51 = vector.extract_strided_slice %4 {offsets = [9, 0], sizes = [1, 256], strides = [1, 1]} : vector<18x256xf32> to vector<1x256xf32>
    %52 = arith.mulf %50, %51 : vector<1x256xf32>
    %53 = arith.addf %49, %52 : vector<1x256xf32>
    %c16_i32 = arith.constant 16 : i32
    %54 = tpu.dynamic_rotate %44 by %c16_i32 dim 1 : vector<2x256xf32>, i32 -> vector<2x256xf32>
    %55 = vector.extract_strided_slice %54 {offsets = [0, 0], sizes = [1, 256], strides = [1, 1]} : vector<2x256xf32> to vector<1x256xf32>
    %56 = vector.extract_strided_slice %4 {offsets = [1, 0], sizes = [1, 256], strides = [1, 1]} : vector<18x256xf32> to vector<1x256xf32>
    %57 = arith.mulf %55, %56 : vector<1x256xf32>
    %58 = arith.addf %53, %57 : vector<1x256xf32>
    %59 = vector.extract_strided_slice %54 {offsets = [1, 0], sizes = [1, 256], strides = [1, 1]} : vector<2x256xf32> to vector<1x256xf32>
    %60 = vector.extract_strided_slice %4 {offsets = [10, 0], sizes = [1, 256], strides = [1, 1]} : vector<18x256xf32> to vector<1x256xf32>
    %61 = arith.mulf %59, %60 : vector<1x256xf32>
    %62 = arith.addf %58, %61 : vector<1x256xf32>
    %c15_i32 = arith.constant 15 : i32
    %63 = tpu.dynamic_rotate %44 by %c15_i32 dim 1 : vector<2x256xf32>, i32 -> vector<2x256xf32>
    %64 = vector.extract_strided_slice %63 {offsets = [0, 0], sizes = [1, 256], strides = [1, 1]} : vector<2x256xf32> to vector<1x256xf32>
    %65 = vector.extract_strided_slice %4 {offsets = [2, 0], sizes = [1, 256], strides = [1, 1]} : vector<18x256xf32> to vector<1x256xf32>
    %66 = arith.mulf %64, %65 : vector<1x256xf32>
    %67 = arith.addf %62, %66 : vector<1x256xf32>
    %68 = vector.extract_strided_slice %63 {offsets = [1, 0], sizes = [1, 256], strides = [1, 1]} : vector<2x256xf32> to vector<1x256xf32>
    %69 = vector.extract_strided_slice %4 {offsets = [11, 0], sizes = [1, 256], strides = [1, 1]} : vector<18x256xf32> to vector<1x256xf32>
    %70 = arith.mulf %68, %69 : vector<1x256xf32>
    %71 = arith.addf %67, %70 : vector<1x256xf32>
    %c1_i32 = arith.constant 1 : i32
    %72 = tpu.dynamic_rotate %44 by %c1_i32 dim 1 : vector<2x256xf32>, i32 -> vector<2x256xf32>
    %73 = vector.extract_strided_slice %72 {offsets = [0, 0], sizes = [1, 256], strides = [1, 1]} : vector<2x256xf32> to vector<1x256xf32>
    %74 = vector.extract_strided_slice %4 {offsets = [3, 0], sizes = [1, 256], strides = [1, 1]} : vector<18x256xf32> to vector<1x256xf32>
    %75 = arith.mulf %73, %74 : vector<1x256xf32>
    %76 = arith.addf %71, %75 : vector<1x256xf32>
    %77 = vector.extract_strided_slice %72 {offsets = [1, 0], sizes = [1, 256], strides = [1, 1]} : vector<2x256xf32> to vector<1x256xf32>
    %78 = vector.extract_strided_slice %4 {offsets = [12, 0], sizes = [1, 256], strides = [1, 1]} : vector<18x256xf32> to vector<1x256xf32>
    %79 = arith.mulf %77, %78 : vector<1x256xf32>
    %80 = arith.addf %76, %79 : vector<1x256xf32>
    %81 = vector.extract_strided_slice %44 {offsets = [0, 0], sizes = [1, 256], strides = [1, 1]} : vector<2x256xf32> to vector<1x256xf32>
    %82 = vector.extract_strided_slice %4 {offsets = [4, 0], sizes = [1, 256], strides = [1, 1]} : vector<18x256xf32> to vector<1x256xf32>
    %83 = arith.mulf %81, %82 : vector<1x256xf32>
    %84 = arith.addf %80, %83 : vector<1x256xf32>
    %85 = vector.extract_strided_slice %44 {offsets = [1, 0], sizes = [1, 256], strides = [1, 1]} : vector<2x256xf32> to vector<1x256xf32>
    %86 = vector.extract_strided_slice %4 {offsets = [13, 0], sizes = [1, 256], strides = [1, 1]} : vector<18x256xf32> to vector<1x256xf32>
    %87 = arith.mulf %85, %86 : vector<1x256xf32>
    %88 = arith.addf %84, %87 : vector<1x256xf32>
    %c255_i32 = arith.constant 255 : i32
    %89 = tpu.dynamic_rotate %44 by %c255_i32 dim 1 : vector<2x256xf32>, i32 -> vector<2x256xf32>
    %90 = vector.extract_strided_slice %89 {offsets = [0, 0], sizes = [1, 256], strides = [1, 1]} : vector<2x256xf32> to vector<1x256xf32>
    %91 = vector.extract_strided_slice %4 {offsets = [5, 0], sizes = [1, 256], strides = [1, 1]} : vector<18x256xf32> to vector<1x256xf32>
    %92 = arith.mulf %90, %91 : vector<1x256xf32>
    %93 = arith.addf %88, %92 : vector<1x256xf32>
    %94 = vector.extract_strided_slice %89 {offsets = [1, 0], sizes = [1, 256], strides = [1, 1]} : vector<2x256xf32> to vector<1x256xf32>
    %95 = vector.extract_strided_slice %4 {offsets = [14, 0], sizes = [1, 256], strides = [1, 1]} : vector<18x256xf32> to vector<1x256xf32>
    %96 = arith.mulf %94, %95 : vector<1x256xf32>
    %97 = arith.addf %93, %96 : vector<1x256xf32>
    %c241_i32 = arith.constant 241 : i32
    %98 = tpu.dynamic_rotate %44 by %c241_i32 dim 1 : vector<2x256xf32>, i32 -> vector<2x256xf32>
    %99 = vector.extract_strided_slice %98 {offsets = [0, 0], sizes = [1, 256], strides = [1, 1]} : vector<2x256xf32> to vector<1x256xf32>
    %100 = vector.extract_strided_slice %4 {offsets = [6, 0], sizes = [1, 256], strides = [1, 1]} : vector<18x256xf32> to vector<1x256xf32>
    %101 = arith.mulf %99, %100 : vector<1x256xf32>
    %102 = arith.addf %97, %101 : vector<1x256xf32>
    %103 = vector.extract_strided_slice %98 {offsets = [1, 0], sizes = [1, 256], strides = [1, 1]} : vector<2x256xf32> to vector<1x256xf32>
    %104 = vector.extract_strided_slice %4 {offsets = [15, 0], sizes = [1, 256], strides = [1, 1]} : vector<18x256xf32> to vector<1x256xf32>
    %105 = arith.mulf %103, %104 : vector<1x256xf32>
    %106 = arith.addf %102, %105 : vector<1x256xf32>
    %c240_i32 = arith.constant 240 : i32
    %107 = tpu.dynamic_rotate %44 by %c240_i32 dim 1 : vector<2x256xf32>, i32 -> vector<2x256xf32>
    %108 = vector.extract_strided_slice %107 {offsets = [0, 0], sizes = [1, 256], strides = [1, 1]} : vector<2x256xf32> to vector<1x256xf32>
    %109 = vector.extract_strided_slice %4 {offsets = [7, 0], sizes = [1, 256], strides = [1, 1]} : vector<18x256xf32> to vector<1x256xf32>
    %110 = arith.mulf %108, %109 : vector<1x256xf32>
    %111 = arith.addf %106, %110 : vector<1x256xf32>
    %112 = vector.extract_strided_slice %107 {offsets = [1, 0], sizes = [1, 256], strides = [1, 1]} : vector<2x256xf32> to vector<1x256xf32>
    %113 = vector.extract_strided_slice %4 {offsets = [16, 0], sizes = [1, 256], strides = [1, 1]} : vector<18x256xf32> to vector<1x256xf32>
    %114 = arith.mulf %112, %113 : vector<1x256xf32>
    %115 = arith.addf %111, %114 : vector<1x256xf32>
    %c239_i32 = arith.constant 239 : i32
    %116 = tpu.dynamic_rotate %44 by %c239_i32 dim 1 : vector<2x256xf32>, i32 -> vector<2x256xf32>
    %117 = vector.extract_strided_slice %116 {offsets = [0, 0], sizes = [1, 256], strides = [1, 1]} : vector<2x256xf32> to vector<1x256xf32>
    %118 = vector.extract_strided_slice %4 {offsets = [8, 0], sizes = [1, 256], strides = [1, 1]} : vector<18x256xf32> to vector<1x256xf32>
    %119 = arith.mulf %117, %118 : vector<1x256xf32>
    %120 = arith.addf %115, %119 : vector<1x256xf32>
    %121 = vector.extract_strided_slice %116 {offsets = [1, 0], sizes = [1, 256], strides = [1, 1]} : vector<2x256xf32> to vector<1x256xf32>
    %122 = vector.extract_strided_slice %4 {offsets = [17, 0], sizes = [1, 256], strides = [1, 1]} : vector<18x256xf32> to vector<1x256xf32>
    %123 = arith.mulf %121, %122 : vector<1x256xf32>
    %124 = arith.addf %120, %123 : vector<1x256xf32>
    %cst_25 = arith.constant 0.000000e+00 : f32
    %125 = vector.broadcast %cst_25 : f32 to vector<1x256xf32>
    %126 = arith.subf %125, %124 : vector<1x256xf32>
    %127 = math.exp %126 : vector<1x256xf32>
    %cst_26 = arith.constant 1.000000e+00 : f32
    %128 = vector.broadcast %cst_26 : f32 to vector<1x256xf32>
    %129 = arith.addf %128, %127 : vector<1x256xf32>
    %cst_27 = arith.constant 1.000000e+00 : f32
    %130 = vector.broadcast %cst_27 : f32 to vector<1x256xf32>
    %131 = arith.divf %130, %129 : vector<1x256xf32>
    %132 = vector.broadcast %131 : vector<1x256xf32> to vector<16x256xf32>
    %133 = arith.mulf %37, %132 : vector<16x256xf32>
    %c0_28 = arith.constant 0 : index
    %c0_29 = arith.constant 0 : index
    %c0_30 = arith.constant 0 : index
    %134 = vector.load %arg8[%c0_28, %c0_29, %c0_30] : memref<1x16x256xf32, #tpu.memory_space<vmem>>, vector<1x16x256xf32>
    %135 = vector.shape_cast %134 : vector<1x16x256xf32> to vector<16x256xf32>
    %136 = vector.shape_cast %133 : vector<16x256xf32> to vector<1x16x256xf32>
    tpu.vector_store %arg8[%c0_28, %c0_29, %c0_30], %136 {strides = array<i32>} : memref<1x16x256xf32, #tpu.memory_space<vmem>>, vector<1x16x256xf32>,
    return
  }
  func.func @transform_0(%arg0: i32) -> (i32, i32, i32) {
    %c0_i32 = arith.constant 0 : i32
    %c0_i32_0 = arith.constant 0 : i32
    %c0_i32_1 = arith.constant 0 : i32
    return %arg0, %c0_i32, %c0_i32_0 : i32, i32, i32
  }
  func.func @transform_1(%arg0: i32) -> (i32, i32) {
    %c0_i32 = arith.constant 0 : i32
    %c0_i32_0 = arith.constant 0 : i32
    %c0_i32_1 = arith.constant 0 : i32
    return %c0_i32, %c0_i32_0 : i32, i32
  }
  func.func @transform_2(%arg0: i32) -> (i32, i32) {
    %c0_i32 = arith.constant 0 : i32
    %c0_i32_0 = arith.constant 0 : i32
    %c0_i32_1 = arith.constant 0 : i32
    return %c0_i32, %c0_i32_0 : i32, i32
  }
  func.func @transform_3(%arg0: i32) -> (i32, i32) {
    %c0_i32 = arith.constant 0 : i32
    %c0_i32_0 = arith.constant 0 : i32
    %c0_i32_1 = arith.constant 0 : i32
    return %c0_i32, %c0_i32_0 : i32, i32
  }
  func.func @transform_4(%arg0: i32) -> (i32, i32) {
    %c0_i32 = arith.constant 0 : i32
    %c0_i32_0 = arith.constant 0 : i32
    %c0_i32_1 = arith.constant 0 : i32
    return %c0_i32, %c0_i32_0 : i32, i32
  }
  func.func @transform_5(%arg0: i32) -> (i32, i32) {
    %c0_i32 = arith.constant 0 : i32
    %c0_i32_0 = arith.constant 0 : i32
    %c0_i32_1 = arith.constant 0 : i32
    return %c0_i32, %c0_i32_0 : i32, i32
  }
  func.func @transform_6(%arg0: i32) -> i32 {
    %c0_i32 = arith.constant 0 : i32
    %c0_i32_0 = arith.constant 0 : i32
    return %c0_i32 : i32
  }
  func.func @transform_7(%arg0: i32) -> (i32, i32, i32) {
    %c0_i32 = arith.constant 0 : i32
    %c0_i32_0 = arith.constant 0 : i32
    %c0_i32_1 = arith.constant 0 : i32
    return %arg0, %c0_i32, %c0_i32_0 : i32, i32, i32
  }
}

</mosaic_0001>

<bundles_post_ra>
// kernel: tpu_custom_call.1
= control target key start
LH: loop header
LB: loop body
LE: loop exit
PB: predicated region body
PF: predicated region fallthrough
CT: control target
= control target key end

     0   :  { %s1538_s0 = inlined_call_operand.hbm [shape: f32[2,16,256], index: 0, kind: input, shape index: {}]   ;;  %s1539_s1 = inlined_call_operand.vmem [shape: f32[2,16], index: 1, kind: input, shape index: {}]   ;;  %s1540_s2 = inlined_call_operand.vmem [shape: f32[2,1], index: 2, kind: input, shape index: {}]   ;;  %s1541_s3 = inlined_call_operand.vmem [shape: f32[16,2], index: 3, kind: input, shape index: {}]   ;;  %s1542_s4 = inlined_call_operand.vmem [shape: f32[16,1], index: 4, kind: input, shape index: {}]   ;;  %s1543_s5 = inlined_call_operand.hbm [shape: f32[18,256], index: 5, kind: input, shape index: {}]   ;;  %s1544_s6 = inlined_call_operand.<no memory space> [shape: f32[1], index: 6, kind: input, shape index: {}]   ;;  %s1545_s7 = inlined_call_operand.hbm [shape: f32[2,16,256], index: 7, kind: output, shape index: {}]  }
   0x1   :  { %12 = sst [smem:[#allocation2]] %s1544_s6 }
   0x2   :  { %13 = vsyncpa [#allocation4], 0 }
   0x3   :  { %15 = vsyncpa [#allocation4 + $0x1], 0 }
   0x4   :  { %16 = vsyncpa [#allocation7], 0 }
   0x5   :  { %17 = vsyncpa [#allocation5], 0 }
   0x6   :  { %19 = vsyncpa [#allocation5 + $0x1], 0  ;;  %s1235_s26 = smov 0   ;;  %s1237_s27 = smov 0  }
   0x7   :  { %s1239_s28 = smov 0   ;;  %s1241_s29 = smov 0  }
   0x8 LB: > { %s1256_s6 = sadd.s32 4294967295, %s1175_s29   ;;  %s929_s30 = sadd.s32 4294967294, %s1175_s29   ;;  %s1175_s29 = sphi %s1241_s29, %s1559_s29   ;;  %s1171_s28 = sphi %s1239_s28, %s1558_s28   ;;  %s1167_s27 = sphi %s1237_s27, %s1557_s27   ;;  %s1163_s26 = sphi %s1235_s26, %s1556_s26  }
   0x9   : > { %p45_p0 = scmp.ne.s32.totalorder %s1167_s27, %s1163_s26  ;;  %p46_p1 = scmp.eq.s32.totalorder %s1256_s6, 0 }
   0xa   : > { %p195_p2 = scmp.eq.s32.totalorder %s1256_s6, 1  ;;  %p201_p3 = scmp.eq.s32.totalorder %s929_s30, 1 }
   0xb   : > { %p1265_p4 = por %p46_p1, %p45_p0  ;;  %p930_p5 = scmp.ge.s32.totalorder %s1175_s29, 1 }
   0xc   : > { %p1270_p6 = por %p201_p3, %p45_p0  ;;  %p208_p7 = scmp.lt.s32.totalorder %s1175_s29, 3 }
   0xd   : > { %s231_s12 = sshll.u32 %s1543_s5, 4  ;;  %s1177_s14 = smov [#allocation6]   ;;  %s232_s12 = int_to_ptr.hbm [resolvable:$true] %s231_s12 }
   0xe   : > { %p1278_p8 = pnand %p930_p5, %p208_p7  ;;  %s233_s15 = sshll.u32 %s1177_s14, 4  ;;  %s234_s15 = int_to_ptr.vmem [resolvable:$true] %s233_s15 }
   0xf   : > { %s1288_s16 = sadd.s32 1, %s1175_s29   ;;  %s1546_s17 = smov 256  }
  0x10   : > { %p960_p9 = pneg %p1278_p8  ;;  %s1547_s18 = smov 16  }
  0x11   : > { %s29_s19 = ssub.s32 %s1175_s29, %s1288_s16  ;;  %s32_s20 = sadd.s32 1, %s1171_s28 }
  0x12   : > { %p961_p10 = pnand %p960_p9, %p46_p1  ;;  %p30_p12 = scmp.eq.s32.totalorder %s29_s19, 0 }
  0x13   : > { %p39_p13 = scmp.ne.s32.totalorder %s1171_s28, %s1167_s27  ;;  %p40_p0 = scmp.eq.s32.totalorder %s1175_s29, 0 }
  0x14   : > { %963 = dma.hbm_to_vmem [thread:$0]  (!%p961_p10), %s232_s12, 768, %s234_s15, [#allocation7], %s1546_s17, %s1546_s17, %s1547_s18  }
  0x15   : > { %s1300_s21 = scalar_select %p30_p12, %s1171_s28, %s32_s20  }
  0x16   : > { %p1304_p3 = por %p195_p2, %p39_p13  ;;  %p973_p5 = scmp.lt.s32.totalorder %s1175_s29, 2 }
  0x17   : > { %s250_s23 = sand.u32 1, %s1171_s28   ;;  %s949_s24 = sshll.u32 %s1175_s29, 5 }
  0x18   : > { %p41_p7 = por %p40_p0, %p39_p13  ;;  %s933_s25 = sshll.u32 %s250_s23, 5 }
  0x19   : > { %s259_s11 = scalar_lea.hbm %s1538_s0, %s949_s24  ;;  %s254_s14 = scalar_lea.vmem [#allocation3], %s933_s25 }
  0x1a   : > { %s260_s12 = sshll.u32 %s259_s11, 4  ;;  %s262_s15 = sshll.u32 %s254_s14, 4  ;;  %s261_s12 = int_to_ptr.hbm [resolvable:$true] %s260_s12  ;;  %s263_s15 = int_to_ptr.vmem [resolvable:$true] %s262_s15 }
  0x1b   : > { %p1314_p9 = pnand %p973_p5, %p41_p7  ;;  %s251_s20 = scalar_lea.sflag [#allocation4], %s250_s23 }
  0x1c   : > { %s1075_s17 = sshra.s32 %s261_s12, 4  ;;  %s1082_s25 = scalar_lea.hbm %s1538_s0, 64  ;;  %s1076_s17 = int_to_ptr.hbm [resolvable:$true] %s1075_s17 }
  0x1d   : > { %s1077_s18 = scalar_lea.hbm %s1076_s17, 32  ;;  %p1079_p10 = pneg %p1314_p9 }
  0x1e   : > { %p1078_p2 = scmp.ne.s32.totalorder %s1076_s17, %s1077_s18  ;;  %p1083_p0 = scmp.lt.s32.totalorder %s1076_s17, %s1538_s0 }
  0x1f   : > { %p1084_p5 = scmp.lt.s32.totalorder %s1082_s25, %s1077_s18 }
  0x20   : > { %p1080_p12 = pnand %p1079_p10, %p1078_p2 }
  0x21   : > { %p1085_p7 = por %p1084_p5, %p1083_p0 }
  0x22   : > { %p1081_p13 = pneg %p1080_p12 }
  0x24   : > { %p1086_p11 = pnand %p1085_p7, %p1081_p13 }
  0x26   : > { %1089 = shalt.err (!%p1086_p11)
}
  0x27   : > { %s1553_s23 = smov 16   ;;  %s1554_s14 = smov 256  }
  0x28   : > { %967 = dma.hbm_to_vmem [thread:$0]  (!%p1314_p9), %s261_s12, 512, %s263_s15, %s251_s20, %s1554_s14, %s1554_s14, %s1553_s23  }
  0x29   : > { %274 = sbr.rel (%p1278_p8) target bundleno = 907 (0x38b), region = 48  ;;  %s1334_s24 = sand.u32 (!%p1278_p8), 1, %s1167_s27  }
  0x2a   : > { %s937_s17 = sshll.u32 (!%p1278_p8), %s1334_s24, 5  ;;  %s277_s18 = scalar_lea.sflag (!%p1278_p8), [#allocation4], %s1334_s24 }
  0x2b   : > { %s280_s30 = scalar_lea.vmem (!%p1278_p8), [#allocation3], %s937_s17 }
  0x2e   : > { %1150 = dma.done.wait (%p1265_p4), %s277_s18, 512  }
  0x2f   : > { %1152 = vsyncadd (%p1265_p4), %s277_s18, 4294966784 }
  0x30   : > { %1154 = dma.done.wait (%p46_p1), [#allocation7], 768  }
  0x31   : > { %1156 = vsyncadd (%p46_p1), [#allocation7], 4294966528  ;;  %v1348_v0 = vld [vmem:[%s280_s30 + $0x10] sm:$0xff]  ;;  %v1350_v1 = vld [vmem:[%s280_s30 + $0x18] sm:$0xff]  ;;  %v1180_v8 = vmov 256.0   ;;  %v1181_v12 = vmov 0  }
  0x32   : > { %v339_v2 = vadd.f32 %v1350_v1, %v1348_v0  ;;  %v354_v3 = vmax.f32 %v1348_v0, %v1350_v1  ;;  %v1356_v4 = vld [vmem:[%s280_s30] sm:$0xff]  ;;  %v1358_v5 = vld [vmem:[%s280_s30 + $0x8] sm:$0xff]  ;;  %1025 = vrcp.f32 %v1180_v8  ;;  %1023 = vset.pattern.permute.xlu2 %v1181_v12  ;;  %1024 = vset.pattern.permute.xlu0 %v1181_v12  ;;  %vm357_vm1 = vcmask 7168   ;;  %s1182_s30 = smov 127   ;;  %s1184_s8 = smov 17  }
  0x33   : > { %v336_v6 = vadd.f32 %v1358_v5, %v1356_v4  ;;  %v351_v7 = vmax.f32 %v1356_v4, %v1358_v5  ;;  %v318_v10 = vld [vmem:[%s1540_s2] sm:$0x3]  ;;  %vm365_vm2 = vcmask 130048   ;;  %v322_v27 = vld [vmem:[%s1542_s4 + $0x8] sm:$0xff]  ;;  %vm407_vm3 = vcmask 1041408   ;;  %s1185_s13 = smov 15  }
  0x34   : > { %340 = vadd.xlane.f32.xlu0 %v339_v2  ;;  %355 = vmax.xlane.f32.xlu1 %v354_v3  ;;  %v321_v14 = vld [vmem:[%s1542_s4] sm:$0xff]  ;;  %vm400_vm4 = vcmask 15360   ;;  %v320_v33 = vld [vmem:[%s1541_s3 + $0x8] sm:$0xff]  ;;  %v1183_v12 = vmov 16.0   ;;  %vm533_vm14 = vcmask 1040384   ;;  %s1186_s12 = smov 16  }
  0x35   : > { %362 = vperm.xlu2 %1023, %v318_v10   ;;  %v317_v25 = vld [vmem:[%s1539_s1] sm:$0x3]  ;;  %s1187_s15 = smov 1   ;;  %s1188_s19 = smov 113  }
  0x36   : > { %v319_v32 = vld [vmem:[%s1541_s3] sm:$0xff]  ;;  %s1189_s20 = smov 112   ;;  %s1190_s25 = smov 111  }
  0x37   : > { %s329_s10 = sld [smem:[#allocation2]]  ;;  %s950_s11 = sshll.u32 %s1256_s6, 5 }
  0x38   : > { %v1026_v9 = vpop.eup %1025  ;;  %s842_s18 = scalar_lea.hbm %s1545_s7, %s950_s11  ;;  %s316_s6 = scalar_lea.vmem [#allocation8], %s937_s17 }
  0x39   : > { %v343_v11 = vmul.f32 256.0, %v1026_v9  ;;  %vm347_vm0 = vweird.f32 %v1026_v9 }
  0x3b   : > { %v344_v13 = vsub.f32 1.0, %v343_v11 }
  0x3c   : > { %337 = vadd.xlane.f32.xlu0 %v336_v6  ;;  %352 = vmax.xlane.f32.xlu1 %v351_v7 }
  0x3d   : > { %v345_v15 = vmul.f32 %v1026_v9, %v344_v13  ;;  %392 = vperm.xlu2 %1023, %v321_v14  }
  0x3f   : > { %v346_v16 = vadd.f32 %v1026_v9, %v345_v15 }
  0x41   : > { %v348_v17 = vsel %vm347_vm0, %v1026_v9, %v346_v16 }
  0x50   : > { %397 = vperm.xlu0 %1024, %v322_v27  }
  0x8f   : > { %v363_v28 = vpop.permute.xlu2 %362 }
  0x97   : > { %v393_v34 = vpop.permute.xlu2 %392 }
  0xa7   : > { %v341_v18 = vpop.xlane.xlu0 %340  ;;  %v356_v19 = vpop.xlane.xlu1 %355 }
  0xa8   : > { %v350_v20 = vmul.f32 %v348_v17, %v341_v18 }
  0xaa   : > { %v359_v21 = vsel %vm357_vm1, %v350_v20, %v356_v19 }
  0xab   : > { %383 = vmatpush.msra.mxu0 %v359_v21 }
  0xaf   : > { %v338_v22 = vpop.xlane.xlu0 %337  ;;  %v353_v23 = vpop.xlane.xlu1 %352 }
  0xb0   : > { %v349_v24 = vmul.f32 %v348_v17, %v338_v22 }
  0xb2   : > { %v358_v26 = vsel %vm357_vm1, %v349_v24, %v353_v23 }
  0xb3   : > { %384 = vmatpush.msra.mxu0 %v358_v26 }
  0xb4   : > { %940 = vmatmul.msk.f32.vlgmr.msra.gmra.mxu0 %vm365_vm2, %v317_v25 }
  0xc2   : > { %v398_v37 = vpop.permute.xlu0 %397 }
 0x131   : > { %v386_v29 = vpop.f32.mrf.mxu0 }
 0x132   : > { %v387_v30 = vadd.f32 %v386_v29, %v363_v28 }
 0x134   : > { %v389_v31 = vmax.f32 %v387_v30, 0.0 }
 0x136   : > { %941 = vmatpush.msk.msra.mxu1 %vm407_vm3, %v389_v31  ;;  %951 = vmatpush.msk.msra.mxu2 %vm407_vm3, %v389_v31 }
 0x137   : > { %942 = vmatmul.msk.f32.vlgmr.msra.gmra.mxu1 %vm400_vm4, %v319_v32  ;;  %943 = vmatmul.msk.f32.vlgmr.msra.gmra.mxu2 %vm400_vm4, %v320_v33 }
 0x1b4   : > { %v428_v35 = vpop.f32.mrf.mxu1 }
 0x1b5   : > { %v429_v36 = vadd.f32 %v428_v35, %v393_v34 }
 0x1b7   : > { %436 = vrot.lane.b32.xlu1 %v429_v36, %s1182_s30 }
 0x1ba   : > { %v431_v38 = vpop.f32.mrf.mxu2 }
 0x1bb   : > { %v432_v39 = vadd.f32 %v431_v38, %v398_v37 }
 0x1bd   : > { %438 = vrot.lane.b32.xlu2 %v432_v39, %s1182_s30 }
 0x217   : > { %v439_v40 = vpop.permute.xlu2 %438 }
 0x218   : > { %v443_v41 = vadd.f32 %v439_v40, %v432_v39 }
 0x21a   : > { %v445_v42 = vsub.f32 0.0, %v443_v41 }
 0x21c   : > { %v448_v43 = vmul.f32 1.442695, %v445_v42 }
 0x21e   : > { %1027 = vpow2.f32 %v448_v43 }
 0x224   : > { %v1028_v47 = vpop.eup %1027 }
 0x225   : > { %v451_v49 = vadd.f32 1.0, %v1028_v47 }
 0x227   : > { %v478_v7 = vand.u32 2147483648, %v451_v49  ;;  %vm472_vm10 = vweird.f32 %v451_v49  ;;  %v476_v8 = vand.u32 2147483647, %v451_v49 }
 0x229   : > { %v437_v44 = vpop.permute.xlu1 %436  ;;  %v479_v10 = vor.u32 1.1754944e-38, %v478_v7  ;;  %vm477_vm12 = vcmp.eq.f32.partialorder %v476_v8, 8.507059e+37 }
 0x22a   : > { %v442_v45 = vadd.f32 %v437_v44, %v429_v36 }
 0x22c   : > { %v444_v46 = vsub.f32 0.0, %v442_v45 }
 0x22e   : > { %v446_v48 = vmul.f32 1.442695, %v444_v46 }
 0x230   : > { %1029 = vpow2.f32 %v446_v48 }
 0x231   : > { %1031 = vrcp.f32 %v451_v49 }
 0x236   : > { %v1030_v50 = vpop.eup %1029 }
 0x237   : > { %v450_v51 = vadd.f32 1.0, %v1030_v50  ;;  %v1032_v52 = vpop.eup %1031 }
 0x238   : > { %v468_v53 = vmul.f32 %v1032_v52, %v451_v49  ;;  %vm473_vm9 = vweird.f32 %v1032_v52 }
 0x239   : > { %1033 = vrcp.f32 %v450_v51  ;;  %v463_v58 = vand.u32 2147483648, %v450_v51  ;;  %v461_v60 = vand.u32 2147483647, %v450_v51  ;;  %vm457_vm6 = vweird.f32 %v450_v51  ;;  %vm474_vm11 = vmor %vm472_vm10, %vm473_vm9 }
 0x23a   : > { %v469_v57 = vsub.f32 1.0, %v468_v53  ;;  %1035 = vrcp.f32 %v1183_v12 }
 0x23b   : > { %v464_v63 = vor.u32 1.1754944e-38, %v463_v58  ;;  %vm462_vm8 = vcmp.eq.f32.partialorder %v461_v60, 8.507059e+37  ;;  %v1435_v60 = vld [vmem:[#allocation6 + $0x10] sm:$0xff] }
 0x23c   : > { %v470_v62 = vmul.f32 %v1032_v52, %v469_v57  ;;  %v1431_v57 = vld [vmem:[#allocation6] sm:$0xff] }
 0x23e   : > { %v471_v6 = vadd.f32 %v1032_v52, %v470_v62  ;;  %v330_v62 = vstv %s329_s10 }
 0x23f   : > { %v1034_v54 = vpop.eup %1033 }
 0x240   : > { %v453_v55 = vmul.f32 %v1034_v54, %v450_v51  ;;  %vm458_vm5 = vweird.f32 %v1034_v54  ;;  %v475_v9 = vsel %vm474_vm11, %v1032_v52, %v471_v6  ;;  %v1036_v14 = vpop.eup %1035 }
 0x241   : > { %vm459_vm7 = vmor %vm457_vm6, %vm458_vm5  ;;  %v480_v11 = vsel %vm477_vm12, %v479_v10, %v475_v9  ;;  %v511_v15 = vmul.f32 16.0, %v1036_v14  ;;  %vm515_vm13 = vweird.f32 %v1036_v14 }
 0x242   : > { %v454_v56 = vsub.f32 1.0, %v453_v55 }
 0x243   : > { %v512_v21 = vsub.f32 1.0, %v511_v15  ;;  %v568_v15 = vrot.slane %v1431_v57, 1 }
 0x244   : > { %v455_v59 = vmul.f32 %v1034_v54, %v454_v56 }
 0x245   : > { %v513_v27 = vmul.f32 %v1036_v14, %v512_v21  ;;  %v578_v21 = vrot.slane %v1435_v60, 1 }
 0x246   : > { %v456_v61 = vadd.f32 %v1034_v54, %v455_v59  ;;  %v1433_v59 = vld [vmem:[#allocation6 + $0x8] sm:$0xff] }
 0x247   : > { %v514_v35 = vadd.f32 %v1036_v14, %v513_v27 }
 0x248   : > { %v460_v2 = vsel %vm459_vm7, %v1034_v54, %v456_v61  ;;  %v540_v54 = vlaneseq  ;;  %v1437_v61 = vld [vmem:[#allocation6 + $0x18] sm:$0xff] }
 0x249   : > { %v465_v3 = vsel %vm462_vm8, %v464_v63, %v460_v2  ;;  %v516_v44 = vsel %vm515_vm13, %v1036_v14, %v514_v35 }
 0x24a   : > { %484 = vperm.xlu2 %1023, %v465_v3   ;;  %v1428_v56 = vand.u32 127, %v540_v54  ;;  %v658_v54 = vrot.slane %v1435_v60, 4 }
 0x24c   : > { %vm542_vm15 = vcmp.lt.s32.totalorder %v1428_v56, 17  ;;  %vm596_vm0 = vcmp.lt.s32.totalorder %v1428_v56, 15  ;;  %vm563_vm1 = vcmp.lt.s32.totalorder %v1428_v56, 16  ;;  %vm625_vm2 = vcmp.lt.s32.totalorder %v1428_v56, 1 }
 0x24d   : > { %vm705_vm3 = vcmp.lt.s32.totalorder %v1428_v56, 113  ;;  %vm676_vm4 = vcmp.lt.s32.totalorder %v1428_v56, 127  ;;  %vm734_vm5 = vcmp.lt.s32.totalorder %v1428_v56, 112  ;;  %vm765_vm6 = vcmp.lt.s32.totalorder %v1428_v56, 111 }
 0x252   : > { %489 = vperm.xlu2 %1023, %v480_v11  }
 0x2a4   : > { %v485_v13 = vpop.permute.xlu2 %484 }
 0x2a5   : > { %v1385_v17 = vmul.f32 %v485_v13, %v1356_v4  ;;  %v1388_v18 = vmul.f32 %v485_v13, %v1358_v5 }
 0x2ac   : > { %v490_v16 = vpop.permute.xlu2 %489 }
 0x2ad   : > { %v1391_v19 = vmul.f32 %v490_v16, %v1348_v0  ;;  %v1394_v20 = vmul.f32 %v490_v16, %v1350_v1  ;;  %v569_v16 = vrot.slane %v1433_v59, 1 }
 0x2af   : > { %v496_v22 = vadd.f32 %v1391_v19, %v1385_v17  ;;  %v503_v23 = vadd.f32 %v1394_v20, %v1388_v18  ;;  %v519_v4 = vmax.f32 %v1385_v17, %v1391_v19  ;;  %v526_v5 = vmax.f32 %v1388_v18, %v1394_v20 }
 0x2b1   : > { %v497_v24 = vrot.slane %v496_v22, 4  ;;  %v504_v25 = vrot.slane %v503_v23, 4  ;;  %v520_v0 = vrot.slane %v519_v4, 4  ;;  %v527_v26 = vrot.slane %v526_v5, 4 }
 0x2b3   : > { %v498_v1 = vadd.f32 %v497_v24, %v496_v22  ;;  %v505_v28 = vadd.f32 %v504_v25, %v503_v23  ;;  %v521_v29 = vmax.f32 %v519_v4, %v520_v0  ;;  %v528_v30 = vmax.f32 %v526_v5, %v527_v26 }
 0x2b4   : > { %v579_v22 = vrot.slane %v1437_v61, 1  ;;  %v607_v23 = vrot.slane %v1435_v60, 2  ;;  %v608_v4 = vrot.slane %v1437_v61, 2  ;;  %v599_v5 = vrot.slane %v1431_v57, 2 }
 0x2b5   : > { %v499_v31 = vrot.slane %v498_v1, 2  ;;  %v506_v32 = vrot.slane %v505_v28, 2  ;;  %v522_v33 = vrot.slane %v521_v29, 2  ;;  %v529_v34 = vrot.slane %v528_v30, 2 }
 0x2b6   : > { %v600_v24 = vrot.slane %v1433_v59, 2 }
 0x2b7   : > { %v500_v36 = vadd.f32 %v499_v31, %v498_v1  ;;  %v507_v37 = vadd.f32 %v506_v32, %v505_v28  ;;  %v523_v38 = vmax.f32 %v521_v29, %v522_v33  ;;  %v530_v39 = vmax.f32 %v528_v30, %v529_v34 }
 0x2b9   : > { %v501_v40 = vrot.slane %v500_v36, 1  ;;  %v508_v41 = vrot.slane %v507_v37, 1  ;;  %v524_v42 = vrot.slane %v523_v38, 1  ;;  %v531_v43 = vrot.slane %v530_v39, 1 }
 0x2bb   : > { %v502_v45 = vadd.f32 %v501_v40, %v500_v36  ;;  %v509_v46 = vadd.f32 %v508_v41, %v507_v37  ;;  %v525_v49 = vmax.f32 %v523_v38, %v524_v42  ;;  %v532_v50 = vmax.f32 %v530_v39, %v531_v43 }
 0x2bc   : > { %v650_v37 = vrot.slane %v1431_v57, 4  ;;  %v628_v43 = vrot.slane %v1431_v57, 3 }
 0x2bd   : > { %v517_v47 = vmul.f32 %v516_v44, %v502_v45  ;;  %v518_v48 = vmul.f32 %v516_v44, %v509_v46  ;;  %v629_v44 = vrot.slane %v1433_v59, 3  ;;  %v651_v45 = vrot.slane %v1433_v59, 4 }
 0x2bf   : > { %v1404_v51 = vsel %vm533_vm14, %v517_v47, %v525_v49  ;;  %v1406_v52 = vsel %vm533_vm14, %v518_v48, %v532_v50  ;;  %v636_v50 = vrot.slane %v1435_v60, 3 }
 0x2c0   : > { %538 = vrot.lane.b32.xlu1 %v1406_v52, %s1184_s8  ;;  %592 = vrot.lane.b32.xlu0 %v1404_v51, %s1185_s13 }
 0x2c1   : > { %536 = vrot.lane.b32.xlu2 %v1404_v51, %s1184_s8  ;;  %s845_s8 = sshll.u32 %s842_s18, 4  ;;  %s846_s8 = int_to_ptr.hbm [resolvable:$true] %s845_s8 }
 0x2c8   : > { %561 = vrot.lane.b32.xlu1 %v1406_v52, %s1186_s12  ;;  %623 = vrot.lane.b32.xlu0 %v1406_v52, %s1187_s15 }
 0x2c9   : > { %559 = vrot.lane.b32.xlu2 %v1404_v51, %s1186_s12 }
 0x2d0   : > { %621 = vrot.lane.b32.xlu1 %v1404_v51, %s1187_s15  ;;  %701 = vrot.lane.b32.xlu0 %v1404_v51, %s1188_s19  ;;  %s1119_s15 = sshra.s32 %s846_s8, 4  ;;  %s1120_s15 = int_to_ptr.hbm [resolvable:$true] %s1119_s15 }
 0x2d1   : > { %594 = vrot.lane.b32.xlu2 %v1406_v52, %s1185_s13  ;;  %s831_s13 = scalar_lea.sflag [#allocation5], %s1334_s24  ;;  %s1121_s17 = scalar_lea.hbm %s1120_s15, 32 }
 0x2d2   : > { %p1122_p1 = scmp.ne.s32.totalorder %s1120_s15, %s1121_s17  ;;  %p1126_p11 = scmp.lt.s32.totalorder %s1120_s15, %s1545_s7 }
 0x2d4   : > { %p1123_p4 = pnand %p1122_p1, %p1304_p3 }
 0x2d6   : > { %p1124_p8 = pneg %p1123_p4 }
 0x2d8   : > { %674 = vrot.lane.b32.xlu1 %v1406_v52, %s1182_s30  ;;  %732 = vrot.lane.b32.xlu0 %v1406_v52, %s1189_s20 }
 0x2d9   : > { %672 = vrot.lane.b32.xlu2 %v1404_v51, %s1182_s30  ;;  %s843_s30 = sshll.u32 %s316_s6, 4  ;;  %s844_s30 = int_to_ptr.vmem [resolvable:$true] %s843_s30 }
 0x2e0   : > { %730 = vrot.lane.b32.xlu1 %v1404_v51, %s1189_s20 }
 0x2e1   : > { %703 = vrot.lane.b32.xlu2 %v1406_v52, %s1188_s19 }
 0x2e8   : > { %763 = vrot.lane.b32.xlu1 %v1406_v52, %s1190_s25 }
 0x2e9   : > { %761 = vrot.lane.b32.xlu2 %v1404_v51, %s1190_s25  ;;  %s1125_s25 = scalar_lea.hbm %s1545_s7, 64 }
 0x2ea   : > { %p1127_p9 = scmp.lt.s32.totalorder %s1125_s25, %s1121_s17 }
 0x2ec   : > { %p1128_p2 = por %p1127_p9, %p1126_p11 }
 0x2ee   : > { %p1129_p10 = pnand %p1128_p2, %p1124_p8 }
 0x31b   : > { %v537_v53 = vpop.permute.xlu2 %536 }
 0x323   : > { %v560_v55 = vpop.permute.xlu2 %559 }
 0x32b   : > { %v595_v10 = vpop.permute.xlu2 %594 }
 0x332   : > { %v539_v58 = vpop.permute.xlu1 %538  ;;  %v593_v3 = vpop.permute.xlu0 %592 }
 0x333   : > { %v543_v63 = vsel %vm542_vm15, %v537_v53, %v539_v58  ;;  %v544_v2 = vsel %vm542_vm15, %v539_v58, %v537_v53  ;;  %v597_v25 = vsel %vm596_vm0, %v593_v3, %v595_v10  ;;  %v598_v0 = vsel %vm596_vm0, %v595_v10, %v593_v3  ;;  %v673_v42 = vpop.permute.xlu2 %672 }
 0x334   : > { %v545_v6 = vmul.f32 %v544_v2, %v1431_v57  ;;  %v546_v7 = vmul.f32 %v543_v63, %v1433_v59  ;;  %v549_v8 = vmul.f32 %v544_v2, %v1435_v60  ;;  %v550_v9 = vmul.f32 %v543_v63, %v1437_v61 }
 0x335   : > { %v611_v34 = vmul.f32 %v607_v23, %v598_v0  ;;  %v612_v35 = vmul.f32 %v608_v4, %v597_v25  ;;  %v603_v46 = vmul.f32 %v599_v5, %v598_v0  ;;  %v604_v47 = vmul.f32 %v600_v24, %v597_v25 }
 0x336   : > { %v547_v11 = vadd.f32 %v545_v6, %v330_v62  ;;  %v548_v12 = vadd.f32 %v546_v7, %v330_v62  ;;  %v553_v13 = vrot.slane %v549_v8, 1  ;;  %v554_v14 = vrot.slane %v550_v9, 1 }
 0x337   : > { %v637_v53 = vrot.slane %v1437_v61, 3  ;;  %v615_v58 = vrot.slane %v611_v34, 1  ;;  %v616_v62 = vrot.slane %v612_v35, 1  ;;  %v654_v23 = vmul.f32 %v650_v37, %v1404_v51 }
 0x338   : > { %v557_v27 = vadd.f32 %v553_v13, %v547_v11  ;;  %v558_v1 = vadd.f32 %v554_v14, %v548_v12  ;;  %v679_v25 = vrot.slane %v1431_v57, 5  ;;  %v680_v0 = vrot.slane %v1433_v59, 5 }
 0x33a   : > { %v562_v26 = vpop.permute.xlu1 %561  ;;  %v624_v36 = vpop.permute.xlu0 %623 }
 0x33b   : > { %v564_v28 = vsel %vm563_vm1, %v560_v55, %v562_v26  ;;  %v565_v29 = vsel %vm563_vm1, %v562_v26, %v560_v55  ;;  %v659_v55 = vrot.slane %v1437_v61, 4  ;;  %v687_v26 = vrot.slane %v1435_v60, 5 }
 0x33c   : > { %v572_v30 = vmul.f32 %v568_v15, %v565_v29  ;;  %v573_v31 = vmul.f32 %v569_v16, %v564_v28  ;;  %v582_v32 = vmul.f32 %v578_v21, %v565_v29  ;;  %v583_v33 = vmul.f32 %v579_v22, %v564_v28 }
 0x33d   : > { %v663_v14 = vmul.f32 %v659_v55, %v1406_v52  ;;  %v662_v15 = vmul.f32 %v658_v54, %v1404_v51  ;;  %v655_v16 = vmul.f32 %v651_v45, %v1406_v52  ;;  %v704_v52 = vpop.permute.xlu2 %703  ;;  %v709_v45 = vrot.slane %v1433_v59, 6 }
 0x33e   : > { %v574_v38 = vadd.f32 %v572_v30, %v557_v27  ;;  %v575_v39 = vadd.f32 %v573_v31, %v558_v1  ;;  %v586_v40 = vrot.slane %v582_v32, 1  ;;  %v587_v41 = vrot.slane %v583_v33, 1 }
 0x33f   : > { %v688_v27 = vrot.slane %v1437_v61, 5  ;;  %v667_v29 = vrot.slane %v663_v14, 1  ;;  %v666_v51 = vrot.slane %v662_v15, 1  ;;  %v716_v30 = vrot.slane %v1435_v60, 6 }
 0x340   : > { %v590_v48 = vadd.f32 %v586_v40, %v574_v38  ;;  %v591_v49 = vadd.f32 %v587_v41, %v575_v39  ;;  %v717_v31 = vrot.slane %v1437_v61, 6 }
 0x342   : > { %v605_v63 = vadd.f32 %v603_v46, %v590_v48  ;;  %v606_v2 = vadd.f32 %v604_v47, %v591_v49  ;;  %v622_v3 = vpop.permute.xlu1 %621  ;;  %v702_v24 = vpop.permute.xlu0 %701  ;;  %v327_v48 = vld [vmem:[#allocation6 + $0x20] sm:$0x3]  ;;  %v328_v49 = vld [vmem:[#allocation6 + $0x28] sm:$0x3] }
 0x343   : > { %v626_v6 = vsel %vm625_vm2, %v622_v3, %v624_v36  ;;  %v627_v7 = vsel %vm625_vm2, %v624_v36, %v622_v3  ;;  %v706_v32 = vsel %vm705_vm3, %v702_v24, %v704_v52  ;;  %v707_v33 = vsel %vm705_vm3, %v704_v52, %v702_v24 }
 0x344   : > { %v619_v8 = vadd.f32 %v615_v58, %v605_v63  ;;  %v620_v9 = vadd.f32 %v616_v62, %v606_v2  ;;  %v632_v10 = vmul.f32 %v628_v43, %v627_v7  ;;  %v633_v11 = vmul.f32 %v629_v44, %v626_v6 }
 0x345   : > { %v640_v12 = vmul.f32 %v636_v50, %v627_v7  ;;  %v641_v13 = vmul.f32 %v637_v53, %v626_v6  ;;  %v708_v44 = vrot.slane %v1431_v57, 6  ;;  %v720_v50 = vmul.f32 %v716_v30, %v706_v32 }
 0x346   : > { %v634_v21 = vadd.f32 %v632_v10, %v619_v8  ;;  %v635_v22 = vadd.f32 %v633_v11, %v620_v9  ;;  %v721_v53 = vmul.f32 %v717_v31, %v707_v33  ;;  %v738_v63 = vrot.slane %v1433_v59, 7 }
 0x347   : > { %v644_v4 = vrot.slane %v640_v12, 1  ;;  %v645_v5 = vrot.slane %v641_v13, 1  ;;  %v747_v2 = vrot.slane %v327_v48, 7  ;;  %v748_v3 = vrot.slane %v328_v49, 7 }
 0x348   : > { %v712_v6 = vmul.f32 %v708_v44, %v706_v32  ;;  %v713_v7 = vmul.f32 %v709_v45, %v707_v33  ;;  %v724_v10 = vrot.slane %v720_v50, 1  ;;  %v725_v11 = vrot.slane %v721_v53, 1 }
 0x349   : > { %v648_v1 = vadd.f32 %v644_v4, %v634_v21  ;;  %v649_v28 = vadd.f32 %v645_v5, %v635_v22 }
 0x34a   : > { %v675_v34 = vpop.permute.xlu1 %674  ;;  %v733_v12 = vpop.permute.xlu0 %732 }
 0x34b   : > { %v656_v35 = vadd.f32 %v654_v23, %v648_v1  ;;  %v657_v36 = vadd.f32 %v655_v16, %v649_v28  ;;  %v677_v37 = vsel %vm676_vm4, %v673_v42, %v675_v34  ;;  %v678_v38 = vsel %vm676_vm4, %v675_v34, %v673_v42 }
 0x34c   : > { %v683_v39 = vmul.f32 %v679_v25, %v677_v37  ;;  %v684_v40 = vmul.f32 %v680_v0, %v678_v38  ;;  %v691_v41 = vmul.f32 %v687_v26, %v677_v37  ;;  %v692_v43 = vmul.f32 %v688_v27, %v678_v38  ;;  %v762_v27 = vpop.permute.xlu2 %761 }
 0x34d   : > { %v670_v46 = vadd.f32 %v666_v51, %v656_v35  ;;  %v671_v47 = vadd.f32 %v667_v29, %v657_v36  ;;  %v737_v42 = vrot.slane %v1431_v57, 7 }
 0x34e   : > { %v695_v54 = vrot.slane %v691_v41, 1  ;;  %v696_v55 = vrot.slane %v692_v43, 1 }
 0x34f   : > { %v685_v58 = vadd.f32 %v683_v39, %v670_v46  ;;  %v686_v62 = vadd.f32 %v684_v40, %v671_v47 }
 0x351   : > { %v699_v8 = vadd.f32 %v695_v54, %v685_v58  ;;  %v700_v9 = vadd.f32 %v696_v55, %v686_v62 }
 0x352   : > { %v731_v13 = vpop.permute.xlu1 %730 }
 0x353   : > { %v714_v14 = vadd.f32 %v712_v6, %v699_v8  ;;  %v715_v15 = vadd.f32 %v713_v7, %v700_v9  ;;  %v735_v16 = vsel %vm734_vm5, %v731_v13, %v733_v12  ;;  %v736_v57 = vsel %vm734_vm5, %v733_v12, %v731_v13 }
 0x354   : > { %v741_v21 = vmul.f32 %v737_v42, %v735_v16  ;;  %v742_v59 = vmul.f32 %v738_v63, %v736_v57  ;;  %v751_v22 = vmul.f32 %v747_v2, %v735_v16  ;;  %v752_v23 = vmul.f32 %v748_v3, %v736_v57 }
 0x355   : > { %v728_v4 = vadd.f32 %v724_v10, %v714_v14  ;;  %v729_v5 = vadd.f32 %v725_v11, %v715_v15 }
 0x356   : > { %v755_v0 = vrot.slane %v751_v22, 1  ;;  %v756_v26 = vrot.slane %v752_v23, 1 }
 0x357   : > { %v743_v24 = vadd.f32 %v741_v21, %v728_v4  ;;  %v744_v25 = vadd.f32 %v742_v59, %v729_v5 }
 0x359   : > { %v759_v1 = vadd.f32 %v755_v0, %v743_v24  ;;  %v760_v28 = vadd.f32 %v756_v26, %v744_v25 }
 0x35a   : > { %v764_v52 = vpop.permute.xlu1 %763 }
 0x35b   : > { %v766_v29 = vsel %vm765_vm6, %v762_v27, %v764_v52  ;;  %v767_v51 = vsel %vm765_vm6, %v764_v52, %v762_v27 }
 0x35c   : > { %v768_v30 = vmul.f32 %v766_v29, %v1435_v60  ;;  %v769_v31 = vmul.f32 %v767_v51, %v1437_v61  ;;  %v772_v32 = vmul.f32 %v766_v29, %v327_v48  ;;  %v773_v33 = vmul.f32 %v767_v51, %v328_v49 }
 0x35e   : > { %v770_v34 = vadd.f32 %v768_v30, %v759_v1  ;;  %v771_v35 = vadd.f32 %v769_v31, %v760_v28  ;;  %v776_v36 = vrot.slane %v772_v32, 1  ;;  %v777_v37 = vrot.slane %v773_v33, 1 }
 0x360   : > { %v780_v38 = vadd.f32 %v776_v36, %v770_v34  ;;  %v781_v39 = vadd.f32 %v777_v37, %v771_v35 }
 0x362   : > { %v782_v40 = vsub.f32 0.0, %v780_v38  ;;  %v783_v56 = vsub.f32 0.0, %v781_v39 }
 0x364   : > { %v784_v41 = vmul.f32 1.442695, %v782_v40  ;;  %v786_v43 = vmul.f32 1.442695, %v783_v56 }
 0x366   : > { %1037 = vpow2.f32 %v784_v41 }
 0x367   : > { %1039 = vpow2.f32 %v786_v43 }
 0x36c   : > { %v1038_v44 = vpop.eup %1037 }
 0x36d   : > { %v1040_v45 = vpop.eup %1039  ;;  %v788_v46 = vadd.f32 1.0, %v1038_v44 }
 0x36e   : > { %v789_v60 = vadd.f32 1.0, %v1040_v45 }
 0x36f   : > { %1041 = vrcp.f32 %v788_v46  ;;  %v801_v53 = vand.u32 2147483648, %v788_v46  ;;  %v799_v58 = vand.u32 2147483647, %v788_v46  ;;  %vm795_vm9 = vweird.f32 %v788_v46 }
 0x370   : > { %1043 = vrcp.f32 %v789_v60  ;;  %v816_v62 = vand.u32 2147483648, %v789_v60  ;;  %v814_v63 = vand.u32 2147483647, %v789_v60  ;;  %vm810_vm11 = vweird.f32 %v789_v60 }
 0x371   : > { %v802_v3 = vor.u32 1.1754944e-38, %v801_v53  ;;  %vm800_vm12 = vcmp.eq.f32.partialorder %v799_v58, 8.507059e+37 }
 0x372   : > { %v817_v8 = vor.u32 1.1754944e-38, %v816_v62  ;;  %vm815_vm14 = vcmp.eq.f32.partialorder %v814_v63, 8.507059e+37 }
 0x375   : > { %v1042_v61 = vpop.eup %1041 }
 0x376   : > { %v1044_v47 = vpop.eup %1043  ;;  %v791_v48 = vmul.f32 %v1042_v61, %v788_v46  ;;  %vm796_vm7 = vweird.f32 %v1042_v61 }
 0x377   : > { %v806_v49 = vmul.f32 %v1044_v47, %v789_v60  ;;  %vm811_vm8 = vweird.f32 %v1044_v47  ;;  %vm797_vm10 = vmor %vm795_vm9, %vm796_vm7 }
 0x378   : > { %v792_v50 = vsub.f32 1.0, %v791_v48  ;;  %vm812_vm13 = vmor %vm810_vm11, %vm811_vm8 }
 0x379   : > { %v807_v54 = vsub.f32 1.0, %v806_v49 }
 0x37a   : > { %v793_v55 = vmul.f32 %v1042_v61, %v792_v50 }
 0x37b   : > { %v808_v42 = vmul.f32 %v1044_v47, %v807_v54 }
 0x37c   : > { %v794_v2 = vadd.f32 %v1042_v61, %v793_v55 }
 0x37d   : > { %v809_v6 = vadd.f32 %v1044_v47, %v808_v42 }
 0x37e   : > { %v798_v7 = vsel %vm797_vm10, %v1042_v61, %v794_v2 }
 0x37f   : > { %v803_v9 = vsel %vm800_vm12, %v802_v3, %v798_v7  ;;  %v813_v10 = vsel %vm812_vm13, %v1044_v47, %v809_v6 }
 0x380   : > { %v818_v11 = vsel %vm815_vm14, %v817_v8, %v813_v10  ;;  %v820_v12 = vperm.slane %v803_v9, 0 }
 0x381   : > { %v821_v13 = vperm.slane %v818_v11, 0 }
 0x382   : > { %v822_v14 = vmul.f32 %v820_v12, %v1385_v17  ;;  %v824_v15 = vmul.f32 %v820_v12, %v1391_v19 }
 0x383   : > { %v823_v16 = vmul.f32 %v821_v13, %v1388_v18  ;;  %v825_v57 = vmul.f32 %v821_v13, %v1394_v20 }
 0x384   : > { %826 = vst [vmem:[%s316_s6] sm:$0xff] %v822_v14 }
 0x385   : > { %827 = vst [vmem:[%s316_s6 + $0x8] sm:$0xff] %v823_v16 }
 0x386   : > { %828 = vst [vmem:[%s316_s6 + $0x10] sm:$0xff] %v824_v15 }
 0x387   : > { %829 = vst [vmem:[%s316_s6 + $0x18] sm:$0xff] %v825_v57 }
 0x388   : > { %1132 = shalt.err (!%p1129_p10)
}
 0x389   : > { %s1191_s24 = smov 256  }
 0x38a   : > { %958 = dma.vmem_to_hbm [thread:$0]  (%p1304_p3), %s844_s30, 512, %s846_s8, %s831_s13, %s1191_s24, %s1191_s24, %s1186_s12  }
 0x38b PF: > { %s860_s23 = sand.u32 1, %s1163_s26   ;;  %p1555_p12 = scmp.ge.s32.totalorder %s1175_s29, 2 }
 0x38c   : > { %s861_s14 = scalar_lea.sflag [#allocation5], %s860_s23 }
 0x38d   : > { %p969_p13 = pnand %p1555_p12, %p1270_p6 }
 0x38f   : > { %p970_p0 = pneg %p969_p13 }
 0x391   : > { %1158 = dma.done.wait (%p970_p0), %s861_s14, 512  }
 0x392   : > { %1160 = vsyncadd (%p970_p0), %s861_s14, 4294966784  ;;  %p22_p5 = scmp.ge.s32.totalorder %s1288_s16, 4   ;;  %s1556_s26 = smov %s1167_s27 }
 0x393   : > { %s1557_s27 = smov %s1171_s28  ;;  %s1558_s28 = smov %s1300_s21 }
 0x394   : > { %s1559_s29 = smov %s1288_s16  ;;  %24 = sbr.rel (!%p22_p5) target bundleno = 8 (0x8), region = 97 }
 0x399   :  { %867 = vsyncpa [#allocation4], 1 }
 0x39a   :  { %869 = vsyncpa [#allocation4 + $0x1], 1 }
 0x39b   :  { %870 = vsyncpa [#allocation7], 1 }
 0x39c   :  { %871 = vsyncpa [#allocation5], 1 }
 0x39d   :  { %873 = vsyncpa [#allocation5 + $0x1], 1 }

</bundles_post_ra>
